<compile_context>
chip_gen: v5e
topology: v5e:2x2
jax: 0.10.0
libtpu: 0.0.40
codegen_flags: <defaults>
</compile_context>

<pallas_src>
import jax
import jax.numpy as jnp
from jax.experimental import pallas as pl
from jax.experimental.pallas import tpu as pltpu


def _swish_f32(x):
    # Keep activation math in f32 (EUP sigmoid; v5e has no bf16 VPU/EUP path).
    return x * jax.nn.sigmoid(x)


def _round_up(n, m):
    return ((n + m - 1) // m) * m


_BLOCK_CANDIDATES = (2048, 1024, 512, 256, 128)


def _choose_block_b(B, sublane, max_block=2048):
    """Pick (block_b, B_padded): minimize last-tile padding waste, prefer an
    even grid-step count (v7x has 2 TensorCores), then the largest tile."""
    B_aligned = _round_up(B, sublane)
    if B_aligned <= max_block // 2:
        # Small batch: single tile; per-step overhead dominates any 2-TC gain.
        return B_aligned, B_aligned

    def score(blk):
        b_pad = _round_up(B_aligned, blk)
        steps = b_pad // blk
        waste = b_pad - B_aligned
        return (waste, steps % 2, -blk)

    candidates = [c for c in _BLOCK_CANDIDATES if c <= max_block and c % sublane == 0]
    blk = min(candidates, key=score)
    return blk, _round_up(B_aligned, blk)


def _pick_vmem_limit():
    """Per-generation scoped-VMEM budget: ~3/4 of physical, capped at 96 MiB
    (=> ~96 MiB on v5e/v6e, ~48 MiB on v7x).  Falls back to a 32 MiB value
    that is safe on every generation."""
    try:
        cap = int(pltpu.get_tpu_info().vmem_capacity_bytes)
        return min(96 * 1024 * 1024, (3 * cap) // 4)
    except Exception:
        return 32 * 1024 * 1024


def image_encoder_kernel(x_ref, w1_ref, b1_ref, w2_ref, b2_ref, w3_ref, b3_ref,
                         mu_ref, logvar_ref):
    """mu, logvar = split([fc31|fc32](swish(fc2(swish(fc1(x)))))).

    All hidden intermediates are lane-dense (hidden padded to 128); mu/logvar
    are written directly (no padded slab writeback)."""
    latent = mu_ref.shape[-1]
    x = x_ref[...]

    # fc1 + swish (matmul in compute dtype, f32 accumulation, f32 activation)
    h = jnp.dot(x, w1_ref[...], preferred_element_type=jnp.float32) + b1_ref[...]
    h = _swish_f32(h)

    # fc2 + swish
    h = jnp.dot(h.astype(w2_ref.dtype), w2_ref[...],
                preferred_element_type=jnp.float32) + b2_ref[...]
    h = _swish_f32(h)

    # fused fc31||fc32 head in one MXU pass, then split in VMEM.
    out = jnp.dot(h.astype(w3_ref.dtype), w3_ref[...],
                  preferred_element_type=jnp.float32) + b3_ref[...]
    mu_ref[...] = out[:, :latent].astype(mu_ref.dtype)
    logvar_ref[...] = out[:, latent:2 * latent].astype(logvar_ref.dtype)

    # TODO(synk): optionally fuse the reparameterization sample
    # (mu + exp(0.5*logvar)*eps via pltpu.prng_seed/prng_random_bits) here while
    # the slab is still in VMEM; not done since the module's forward only
    # returns (mu, logvar).


def prepare_params(params, compute_dtype=jnp.bfloat16):
    """Fuse fc31/fc32 into one head, zero-pad the hidden dim to a multiple of
    128 (lane-dense intermediates, full-K MXU passes), and cast matmul operands.

    The hidden-dim zero padding is numerically exact because swish(0) == 0 and
    the padded bias lanes are zero, so padded hidden lanes stay identically
    zero through both layers.  (This invariant breaks if the activation ever
    changes to one with f(0) != 0.)

    Returns ((w1, b1, w2, b2, w3_fused, b3_fused), latent_dim) with weights
    stored (in, out) in `compute_dtype` and biases in f32.  Call ONCE per model.
    """
    w1, b1, w2, b2, w31, b31, w32, b32 = params
    hidden_dim = w1.shape[1]
    latent_dim = w31.shape[1]
    hid_pad = max(_round_up(hidden_dim, 128), 128)
    ph = hid_pad - hidden_dim

    w1p = jnp.pad(w1, ((0, 0), (0, ph)))
    b1p = jnp.pad(b1, ((0, 0), (0, ph)))
    w2p = jnp.pad(w2, ((0, ph), (0, ph)))
    b2p = jnp.pad(b2, ((0, 0), (0, ph)))
    w3p = jnp.pad(jnp.concatenate([w31, w32], axis=1), ((0, ph), (0, 0)))
    b3 = jnp.concatenate([b31, b32], axis=1)

    prepared = (
        w1p.astype(compute_dtype), b1p.astype(jnp.float32),
        w2p.astype(compute_dtype), b2p.astype(jnp.float32),
        w3p.astype(compute_dtype), b3.astype(jnp.float32),
    )
    return prepared, latent_dim


def image_encoder_forward(x, prepared, latent_dim, out_dtype=jnp.float32):
    """x: (B, image_dim + 2) float32.  Returns (mu, logvar): each (B, latent_dim)."""
    w1, b1, w2, b2, w3, b3 = prepared
    B, in_dim = x.shape
    hid_pad = w1.shape[1]
    n_head = w3.shape[1]                  # 2 * latent_dim
    compute_dtype = w1.dtype

    # Native sublane tile of the compute dtype: 8 (f32) / 16 (bf16) / 32 (8-bit).
    sublane = 32 // jnp.dtype(compute_dtype).itemsize
    block_b, B_padded = _choose_block_b(B, sublane)
    grid = (B_padded // block_b,)

    # NOTE: input is quantized to compute_dtype here (bf16 on the fast path).
    x = x.astype(compute_dtype)
    if B_padded != B:
        x = jnp.pad(x, ((0, B_padded - B), (0, 0)))

    itemsize = lambda d: jnp.dtype(d).itemsize
    flops = 2 * B_padded * (in_dim * hid_pad + hid_pad * hid_pad + hid_pad * n_head)
    transcendentals = 2 * B_padded * hid_pad          # two sigmoids per row
    bytes_accessed = (
        B_padded * in_dim * itemsize(compute_dtype)
        + sum(int(a.size) * itemsize(a.dtype) for a in (w1, b1, w2, b2, w3, b3))
        + 2 * B_padded * latent_dim * itemsize(out_dtype)
    )

    def resident(a):
        # Weights/biases: same block for every grid step -> stays in VMEM.
        # (Tiny here; mark pipeline_mode=pl.Buffered(1) if hidden_dim scales up.)
        return pl.BlockSpec(a.shape, lambda i: (0,) * a.ndim)

    mu, logvar = pl.pallas_call(
        image_encoder_kernel,
        out_shape=(
            jax.ShapeDtypeStruct((B_padded, latent_dim), out_dtype),
            jax.ShapeDtypeStruct((B_padded, latent_dim), out_dtype),
        ),
        grid=grid,
        in_specs=[
            pl.BlockSpec((block_b, in_dim), lambda i: (i, 0)),
            resident(w1), resident(b1),
            resident(w2), resident(b2),
            resident(w3), resident(b3),
        ],
        out_specs=(
            pl.BlockSpec((block_b, latent_dim), lambda i: (i, 0)),
            pl.BlockSpec((block_b, latent_dim), lambda i: (i, 0)),
        ),
        compiler_params=pltpu.CompilerParams(
            dimension_semantics=("parallel",),     # shard batch grid across TCs (v7x)
            vmem_limit_bytes=_pick_vmem_limit(),   # per-generation budget
        ),
        cost_estimate=pl.CostEstimate(
            flops=flops,
            transcendentals=transcendentals,
            bytes_accessed=bytes_accessed,
        ),
    )(x, w1, b1, w2, b2, w3, b3)

    if B_padded != B:
        mu, logvar = mu[:B], logvar[:B]
    return mu, logvar


def init_params(key, image_dim, hidden_dim, latent_dim):
    """Deterministic synthetic parameters (same shapes as the PyTorch module,
    but weights stored (in, out))."""
    in_dim = image_dim + 2
    keys = jax.random.split(key, 8)

    def linear(kw, kb, fan_in, fan_out):
        # Uniform(-1/sqrt(fan_in), 1/sqrt(fan_in)) like PyTorch default init.
        bound = 1.0 / jnp.sqrt(jnp.float32(fan_in))
        w = jax.random.uniform(kw, (fan_in, fan_out), jnp.float32, -bound, bound)
        b = jax.random.uniform(kb, (1, fan_out), jnp.float32, -bound, bound)
        return w, b

    w1, b1 = linear(keys[0], keys[1], in_dim, hidden_dim)
    w2, b2 = linear(keys[2], keys[3], hidden_dim, hidden_dim)
    w31, b31 = linear(keys[4], keys[5], hidden_dim, latent_dim)
    w32, b32 = linear(keys[6], keys[7], hidden_dim, latent_dim)
    return (w1, b1, w2, b2, w31, b31, w32, b32)


def reference_forward(x, params):
    """Pure-JAX f32 reference of the PyTorch forward."""
    w1, b1, w2, b2, w31, b31, w32, b32 = params
    h = _swish_f32(x @ w1 + b1)
    h = _swish_f32(h @ w2 + b2)
    return h @ w31 + b31, h @ w32 + b32


if __name__ == "__main__":
    # Small shapes consistent with the module: image_dim=30 -> input dim 32.
    batch, image_dim, hidden_dim, latent_dim = 8, 30, 32, 16

    key = jax.random.PRNGKey(0)
    k_x, k_p = jax.random.split(key)

    x = jax.random.normal(k_x, (batch, image_dim + 2), dtype=jnp.float32)
    params = init_params(k_p, image_dim, hidden_dim, latent_dim)
    mu_ref, logvar_ref = reference_forward(x, params)

    # 1) f32 compute path: tight correctness check of the fused/padded logic.
    prep_f32, ld = prepare_params(params, compute_dtype=jnp.float32)
    mu, logvar = image_encoder_forward(x, prep_f32, ld)
    jax.block_until_ready((mu, logvar))
    assert mu.shape == (batch, latent_dim) and logvar.shape == (batch, latent_dim)
    assert jnp.allclose(mu, mu_ref, atol=1e-5, rtol=1e-5)
    assert jnp.allclose(logvar, logvar_ref, atol=1e-5, rtol=1e-5)

    # 2) bf16 matmul path (MXU-native on v6e/v7x), f32 accumulation: loose check.
    prep_bf16, ld = prepare_params(params, compute_dtype=jnp.bfloat16)
    mu_b, logvar_b = image_encoder_forward(x, prep_bf16, ld)
    jax.block_until_ready((mu_b, logvar_b))
    assert jnp.allclose(mu_b, mu_ref, atol=5e-2, rtol=5e-2)
    assert jnp.allclose(logvar_b, logvar_ref, atol=5e-2, rtol=5e-2)

    # 3) Larger (still cheap) batch exercising the adaptive batch tiling,
    #    row padding, and a multi-step grid.
    big_B = 1024 + 40
    xb = jax.random.normal(k_x, (big_B, image_dim + 2), dtype=jnp.float32)
    mu_big, logvar_big = image_encoder_forward(xb, prep_bf16, ld)
    jax.block_until_ready((mu_big, logvar_big))
    mu_big_ref, logvar_big_ref = reference_forward(xb, params)
    assert mu_big.shape == (big_B, latent_dim)
    assert jnp.allclose(mu_big, mu_big_ref, atol=5e-2, rtol=5e-2)
    assert jnp.allclose(logvar_big, logvar_big_ref, atol=5e-2, rtol=5e-2)

    print("KERNEL_OK")
</pallas_src>

<mosaic_0001>
module attributes {stable_mosaic.version = 11 : i64} {
  func.func @image_encoder_kernel(%arg0: i32, %arg1: memref<8x32xf32, #tpu.memory_space<vmem>>, %arg2: memref<32x128xf32, #tpu.memory_space<vmem>>, %arg3: memref<1x128xf32, #tpu.memory_space<vmem>>, %arg4: memref<128x128xf32, #tpu.memory_space<vmem>>, %arg5: memref<1x128xf32, #tpu.memory_space<vmem>>, %arg6: memref<128x32xf32, #tpu.memory_space<vmem>>, %arg7: memref<1x32xf32, #tpu.memory_space<vmem>>, %arg8: memref<8x16xf32, #tpu.memory_space<vmem>>, %arg9: memref<8x16xf32, #tpu.memory_space<vmem>>) attributes {dimension_semantics = [#tpu.dimension_semantics<parallel>], iteration_bounds = array<i64: 1>, scalar_prefetch = 0 : i64, scratch_operands = 0 : i64, tpu.core_type = #tpu.core_type<tc>, window_params = [{transform_indices = @transform_0, window_bounds = array<i64: 8, 32>}, {pipeline_mode = #tpu.pipeline_mode<synchronous>, transform_indices = @transform_1, window_bounds = array<i64: 32, 128>}, {pipeline_mode = #tpu.pipeline_mode<synchronous>, transform_indices = @transform_2, window_bounds = array<i64: 1, 128>}, {pipeline_mode = #tpu.pipeline_mode<synchronous>, transform_indices = @transform_3, window_bounds = array<i64: 128, 128>}, {pipeline_mode = #tpu.pipeline_mode<synchronous>, transform_indices = @transform_4, window_bounds = array<i64: 1, 128>}, {pipeline_mode = #tpu.pipeline_mode<synchronous>, transform_indices = @transform_5, window_bounds = array<i64: 128, 32>}, {pipeline_mode = #tpu.pipeline_mode<synchronous>, transform_indices = @transform_6, window_bounds = array<i64: 1, 32>}, {transform_indices = @transform_7, window_bounds = array<i64: 8, 16>}, {transform_indices = @transform_8, window_bounds = array<i64: 8, 16>}]} {
    %c0 = arith.constant 0 : index
    %c0_0 = arith.constant 0 : index
    %0 = vector.load %arg1[%c0, %c0_0] : memref<8x32xf32, #tpu.memory_space<vmem>>, vector<8x32xf32>
    %c0_1 = arith.constant 0 : index
    %c0_2 = arith.constant 0 : index
    %1 = vector.load %arg2[%c0_1, %c0_2] : memref<32x128xf32, #tpu.memory_space<vmem>>, vector<32x128xf32>
    %cst = arith.constant dense<0.000000e+00> : vector<8x128xf32>
    %2 = tpu.matmul %0, %1, %cst {dimension_numbers = #tpu.dot_dimension_numbers<[1], [0], [0], [1], [0, 0, 1, 1], [], []>} : vector<8x32xf32>, vector<32x128xf32>, vector<8x128xf32> -> vector<8x128xf32>
    %c0_3 = arith.constant 0 : index
    %c0_4 = arith.constant 0 : index
    %3 = vector.load %arg3[%c0_3, %c0_4] : memref<1x128xf32, #tpu.memory_space<vmem>>, vector<1x128xf32>
    %4 = vector.broadcast %3 : vector<1x128xf32> to vector<8x128xf32>
    %5 = arith.addf %2, %4 : vector<8x128xf32>
    %6 = arith.negf %5 : vector<8x128xf32>
    %7 = math.exp %6 : vector<8x128xf32>
    %cst_5 = arith.constant 1.000000e+00 : f32
    %8 = vector.broadcast %cst_5 : f32 to vector<8x128xf32>
    %9 = arith.addf %8, %7 : vector<8x128xf32>
    %10 = arith.divf %8, %9 : vector<8x128xf32>
    %11 = arith.mulf %5, %10 : vector<8x128xf32>
    %c0_6 = arith.constant 0 : index
    %c0_7 = arith.constant 0 : index
    %12 = vector.load %arg4[%c0_6, %c0_7] : memref<128x128xf32, #tpu.memory_space<vmem>>, vector<128x128xf32>
    %cst_8 = arith.constant dense<0.000000e+00> : vector<8x128xf32>
    %13 = tpu.matmul %11, %12, %cst_8 {dimension_numbers = #tpu.dot_dimension_numbers<[1], [0], [0], [1], [0, 0, 1, 1], [], []>} : vector<8x128xf32>, vector<128x128xf32>, vector<8x128xf32> -> vector<8x128xf32>
    %c0_9 = arith.constant 0 : index
    %c0_10 = arith.constant 0 : index
    %14 = vector.load %arg5[%c0_9, %c0_10] : memref<1x128xf32, #tpu.memory_space<vmem>>, vector<1x128xf32>
    %15 = vector.broadcast %14 : vector<1x128xf32> to vector<8x128xf32>
    %16 = arith.addf %13, %15 : vector<8x128xf32>
    %17 = arith.negf %16 : vector<8x128xf32>
    %18 = math.exp %17 : vector<8x128xf32>
    %cst_11 = arith.constant 1.000000e+00 : f32
    %19 = vector.broadcast %cst_11 : f32 to vector<8x128xf32>
    %20 = arith.addf %19, %18 : vector<8x128xf32>
    %21 = arith.divf %19, %20 : vector<8x128xf32>
    %22 = arith.mulf %16, %21 : vector<8x128xf32>
    %c0_12 = arith.constant 0 : index
    %c0_13 = arith.constant 0 : index
    %23 = vector.load %arg6[%c0_12, %c0_13] : memref<128x32xf32, #tpu.memory_space<vmem>>, vector<128x32xf32>
    %cst_14 = arith.constant dense<0.000000e+00> : vector<8x32xf32>
    %24 = tpu.matmul %22, %23, %cst_14 {dimension_numbers = #tpu.dot_dimension_numbers<[1], [0], [0], [1], [0, 0, 1, 1], [], []>} : vector<8x128xf32>, vector<128x32xf32>, vector<8x32xf32> -> vector<8x32xf32>
    %c0_15 = arith.constant 0 : index
    %c0_16 = arith.constant 0 : index
    %25 = vector.load %arg7[%c0_15, %c0_16] : memref<1x32xf32, #tpu.memory_space<vmem>>, vector<1x32xf32>
    %26 = vector.broadcast %25 : vector<1x32xf32> to vector<8x32xf32>
    %27 = arith.addf %24, %26 : vector<8x32xf32>
    %28 = vector.extract_strided_slice %27 {offsets = [0, 0], sizes = [8, 16], strides = [1, 1]} : vector<8x32xf32> to vector<8x16xf32>
    %c0_17 = arith.constant 0 : index
    %c0_18 = arith.constant 0 : index
    %29 = vector.load %arg8[%c0_17, %c0_18] : memref<8x16xf32, #tpu.memory_space<vmem>>, vector<8x16xf32>
    tpu.vector_store %arg8[%c0_17, %c0_18], %28 {strides = array<i32>} : memref<8x16xf32, #tpu.memory_space<vmem>>, vector<8x16xf32>,
    %30 = vector.extract_strided_slice %27 {offsets = [0, 16], sizes = [8, 16], strides = [1, 1]} : vector<8x32xf32> to vector<8x16xf32>
    %c0_19 = arith.constant 0 : index
    %c0_20 = arith.constant 0 : index
    %31 = vector.load %arg9[%c0_19, %c0_20] : memref<8x16xf32, #tpu.memory_space<vmem>>, vector<8x16xf32>
    tpu.vector_store %arg9[%c0_19, %c0_20], %30 {strides = array<i32>} : memref<8x16xf32, #tpu.memory_space<vmem>>, vector<8x16xf32>,
    return
  }
  func.func @transform_0(%arg0: i32) -> (i32, i32) {
    %c0_i32 = arith.constant 0 : i32
    %c0_i32_0 = arith.constant 0 : i32
    return %arg0, %c0_i32 : i32, i32
  }
  func.func @transform_1(%arg0: i32) -> (i32, i32) {
    %c0_i32 = arith.constant 0 : i32
    %c0_i32_0 = arith.constant 0 : i32
    %c0_i32_1 = arith.constant 0 : i32
    return %c0_i32, %c0_i32_0 : i32, i32
  }
  func.func @transform_2(%arg0: i32) -> (i32, i32) {
    %c0_i32 = arith.constant 0 : i32
    %c0_i32_0 = arith.constant 0 : i32
    %c0_i32_1 = arith.constant 0 : i32
    return %c0_i32, %c0_i32_0 : i32, i32
  }
  func.func @transform_3(%arg0: i32) -> (i32, i32) {
    %c0_i32 = arith.constant 0 : i32
    %c0_i32_0 = arith.constant 0 : i32
    %c0_i32_1 = arith.constant 0 : i32
    return %c0_i32, %c0_i32_0 : i32, i32
  }
  func.func @transform_4(%arg0: i32) -> (i32, i32) {
    %c0_i32 = arith.constant 0 : i32
    %c0_i32_0 = arith.constant 0 : i32
    %c0_i32_1 = arith.constant 0 : i32
    return %c0_i32, %c0_i32_0 : i32, i32
  }
  func.func @transform_5(%arg0: i32) -> (i32, i32) {
    %c0_i32 = arith.constant 0 : i32
    %c0_i32_0 = arith.constant 0 : i32
    %c0_i32_1 = arith.constant 0 : i32
    return %c0_i32, %c0_i32_0 : i32, i32
  }
  func.func @transform_6(%arg0: i32) -> (i32, i32) {
    %c0_i32 = arith.constant 0 : i32
    %c0_i32_0 = arith.constant 0 : i32
    %c0_i32_1 = arith.constant 0 : i32
    return %c0_i32, %c0_i32_0 : i32, i32
  }
  func.func @transform_7(%arg0: i32) -> (i32, i32) {
    %c0_i32 = arith.constant 0 : i32
    %c0_i32_0 = arith.constant 0 : i32
    return %arg0, %c0_i32 : i32, i32
  }
  func.func @transform_8(%arg0: i32) -> (i32, i32) {
    %c0_i32 = arith.constant 0 : i32
    %c0_i32_0 = arith.constant 0 : i32
    return %arg0, %c0_i32 : i32, i32
  }
}

</mosaic_0001>

<bundles_post_ra>
// kernel: tpu_custom_call.1
= control target key start
LH: loop header
LB: loop body
LE: loop exit
PB: predicated region body
PF: predicated region fallthrough
CT: control target
= control target key end

     0   :  { %14 = vsyncpa [#allocation3], 0  ;;  %s508_s0 = inlined_call_operand.hbm [shape: f32[8,32], index: 0, kind: input, shape index: {}]   ;;  %s509_s1 = inlined_call_operand.vmem [shape: f32[32,128], index: 1, kind: input, shape index: {}]   ;;  %s510_s2 = inlined_call_operand.vmem [shape: f32[1,128], index: 2, kind: input, shape index: {}]   ;;  %s511_s3 = inlined_call_operand.vmem [shape: f32[128,128], index: 3, kind: input, shape index: {}]   ;;  %s512_s4 = inlined_call_operand.vmem [shape: f32[1,128], index: 4, kind: input, shape index: {}]   ;;  %s513_s5 = inlined_call_operand.vmem [shape: f32[128,32], index: 5, kind: input, shape index: {}]   ;;  %s514_s6 = inlined_call_operand.vmem [shape: f32[1,32], index: 6, kind: input, shape index: {}]   ;;  %s515_s7 = inlined_call_operand.hbm [shape: f32[8,16], index: 7, kind: output, shape index: {0}]   ;;  %s516_s8 = inlined_call_operand.hbm [shape: f32[8,16], index: 8, kind: output, shape index: {1}]  }
   0x1   :  { %15 = vsyncpa [#allocation4], 0 }
   0x2   :  { %16 = vsyncpa [#allocation7], 0  ;;  %s22_s29 = sshll.u32 %s508_s0, 4  ;;  %s333_s30 = smov [#allocation2]   ;;  %s23_s29 = int_to_ptr.hbm [resolvable:$true] %s22_s29 }
   0x3   :  { %s24_s9 = sshll.u32 %s333_s30, 4  ;;  %s25_s9 = int_to_ptr.vmem [resolvable:$true] %s24_s9 }
   0x4   :  { %27 = dma.hbm_to_vmem [thread:$0]  %s23_s29, 128, %s25_s9, [#allocation3]  }
   0x5   :  { %327 = dma.done.wait [#allocation3], 128  }
   0x6   :  { %328 = vsyncadd [#allocation3], 4294967168  ;;  %v48_v0 = vld [vmem:[%s509_s1 + $0x18] sm:$0xff]  ;;  %v47_v1 = vld [vmem:[%s509_s1 + $0x10] sm:$0xff]  ;;  %vm53_vm0 = vcmask 261120   ;;  %s334_s10 = smov [#allocation5]  }
   0x7   :  { %69 = vmatpush.msra.mxu0 %v48_v0  ;;  %v46_v2 = vld [vmem:[%s509_s1 + $0x8] sm:$0xff]  ;;  %v45_v3 = vld [vmem:[%s509_s1] sm:$0xff]  ;;  %v112_v5 = vld [vmem:[%s511_s3 + $0x78] sm:$0xff]  ;;  %s209_s11 = sshll.u32 %s334_s10, 4  ;;  %s211_s14 = sshll.u32 %s515_s7, 4  ;;  %vm197_vm9 = vcmask 130048   ;;  %s210_s11 = int_to_ptr.vmem [resolvable:$true] %s209_s11  ;;  %s212_s14 = int_to_ptr.hbm [resolvable:$true] %s211_s14 }
   0x8   :  { %v44_v4 = vld [vmem:[#allocation2] sm:$0xff]  ;;  %117 = vmatpush.msra.mxu1 %v112_v5  ;;  %v111_v6 = vld [vmem:[%s511_s3 + $0x70] sm:$0xff]  ;;  %v110_v7 = vld [vmem:[%s511_s3 + $0x68] sm:$0xff]  ;;  %s335_s15 = smov 112   ;;  %s336_s0 = smov [#allocation6]  }
   0x9   :  { %70 = vmatpush.msra.mxu0 %v47_v1  ;;  %v109_v8 = vld [vmem:[%s511_s3 + $0x60] sm:$0xff]  ;;  %v108_v9 = vld [vmem:[%s511_s3 + $0x58] sm:$0xff]  ;;  %v107_v10 = vld [vmem:[%s511_s3 + $0x50] sm:$0xff]  ;;  %s220_s16 = sshll.u32 %s336_s0, 4  ;;  %s221_s16 = int_to_ptr.vmem [resolvable:$true] %s220_s16 }
   0xa   :  { %118 = vmatpush.msra.mxu1 %v111_v6  ;;  %v106_v11 = vld [vmem:[%s511_s3 + $0x48] sm:$0xff]  ;;  %v105_v12 = vld [vmem:[%s511_s3 + $0x40] sm:$0xff]  ;;  %v104_v13 = vld [vmem:[%s511_s3 + $0x38] sm:$0xff] }
   0xb   :  { %71 = vmatpush.msra.mxu0 %v46_v2  ;;  %v103_v14 = vld [vmem:[%s511_s3 + $0x30] sm:$0xff]  ;;  %v102_v15 = vld [vmem:[%s511_s3 + $0x28] sm:$0xff]  ;;  %v101_v16 = vld [vmem:[%s511_s3 + $0x20] sm:$0xff] }
   0xc   :  { %119 = vmatpush.msra.mxu1 %v110_v7  ;;  %v100_v17 = vld [vmem:[%s511_s3 + $0x18] sm:$0xff]  ;;  %v99_v18 = vld [vmem:[%s511_s3 + $0x10] sm:$0xff]  ;;  %v98_v19 = vld [vmem:[%s511_s3 + $0x8] sm:$0xff] }
   0xd   :  { %72 = vmatpush.msra.mxu0 %v45_v3  ;;  %v244_v20 = vld [vmem:[%s510_s2] ss:$0 sm:$0xff]  ;;  %v172_v38 = vld [vmem:[%s513_s5 + $0x78] sm:$0xff]  ;;  %v171_v39 = vld [vmem:[%s513_s5 + $0x70] sm:$0xff] }
   0xe   :  { %237 = vmatmul.msk.f32.vlgmr.msra.gmra.mxu0 %vm53_vm0, %v44_v4  ;;  %120 = vmatpush.msra.mxu1 %v109_v8  ;;  %v97_v21 = vld [vmem:[%s511_s3] sm:$0xff]  ;;  %v170_v40 = vld [vmem:[%s513_s5 + $0x68] sm:$0xff]  ;;  %v168_v42 = vld [vmem:[%s513_s5 + $0x58] sm:$0xff] }
   0xf   :  { %177 = vmatpush.msra.mxu2 %v172_v38  ;;  %v169_v41 = vld [vmem:[%s513_s5 + $0x60] sm:$0xff]  ;;  %v167_v43 = vld [vmem:[%s513_s5 + $0x50] sm:$0xff]  ;;  %v166_v44 = vld [vmem:[%s513_s5 + $0x48] sm:$0xff] }
  0x10   :  { %121 = vmatpush.msra.mxu1 %v108_v9  ;;  %v165_v45 = vld [vmem:[%s513_s5 + $0x40] sm:$0xff]  ;;  %v164_v46 = vld [vmem:[%s513_s5 + $0x38] sm:$0xff]  ;;  %v163_v47 = vld [vmem:[%s513_s5 + $0x30] sm:$0xff] }
  0x11   :  { %178 = vmatpush.msra.mxu2 %v171_v39  ;;  %v162_v48 = vld [vmem:[%s513_s5 + $0x28] sm:$0xff]  ;;  %v161_v49 = vld [vmem:[%s513_s5 + $0x20] sm:$0xff]  ;;  %v160_v50 = vld [vmem:[%s513_s5 + $0x18] sm:$0xff] }
  0x12   :  { %122 = vmatpush.msra.mxu1 %v107_v10  ;;  %v159_v51 = vld [vmem:[%s513_s5 + $0x10] sm:$0xff]  ;;  %v158_v52 = vld [vmem:[%s513_s5 + $0x8] sm:$0xff]  ;;  %v245_v53 = vld [vmem:[%s512_s4] ss:$0 sm:$0xff] }
  0x13   :  { %179 = vmatpush.msra.mxu2 %v170_v40  ;;  %v157_v54 = vld [vmem:[%s513_s5] sm:$0xff] }
  0x14   :  { %123 = vmatpush.msra.mxu1 %v106_v11  ;;  %v246_v7 = vld [vmem:[%s514_s6] ss:$0 sm:$0xff]  ;;  %s222_s6 = sshll.u32 %s516_s8, 4  ;;  %s223_s6 = int_to_ptr.hbm [resolvable:$true] %s222_s6 }
  0x15   :  { %180 = vmatpush.msra.mxu2 %v169_v41 }
  0x16   :  { %124 = vmatpush.msra.mxu1 %v105_v12 }
  0x17   :  { %181 = vmatpush.msra.mxu2 %v168_v42 }
  0x18   :  { %125 = vmatpush.msra.mxu1 %v104_v13 }
  0x19   :  { %182 = vmatpush.msra.mxu2 %v167_v43 }
  0x1a   :  { %126 = vmatpush.msra.mxu1 %v103_v14 }
  0x1b   :  { %183 = vmatpush.msra.mxu2 %v166_v44 }
  0x1c   :  { %127 = vmatpush.msra.mxu1 %v102_v15 }
  0x1d   :  { %184 = vmatpush.msra.mxu2 %v165_v45 }
  0x1e   :  { %128 = vmatpush.msra.mxu1 %v101_v16 }
  0x1f   :  { %185 = vmatpush.msra.mxu2 %v164_v46 }
  0x20   :  { %129 = vmatpush.msra.mxu1 %v100_v17 }
  0x21   :  { %186 = vmatpush.msra.mxu2 %v163_v47 }
  0x22   :  { %130 = vmatpush.msra.mxu1 %v99_v18 }
  0x23   :  { %187 = vmatpush.msra.mxu2 %v162_v48 }
  0x24   :  { %131 = vmatpush.msra.mxu1 %v98_v19 }
  0x25   :  { %188 = vmatpush.msra.mxu2 %v161_v49 }
  0x26   :  { %132 = vmatpush.msra.mxu1 %v97_v21 }
  0x27   :  { %189 = vmatpush.msra.mxu2 %v160_v50 }
  0x29   :  { %190 = vmatpush.msra.mxu2 %v159_v51 }
  0x2b   :  { %191 = vmatpush.msra.mxu2 %v158_v52 }
  0x2d   :  { %192 = vmatpush.msra.mxu2 %v157_v54 }
  0x8b   :  { %v74_v22 = vpop.f32.mrf.mxu0 }
  0x8c   :  { %v75_v23 = vadd.f32 %v244_v20, %v74_v22 }
  0x8e   :  { %v238_v24 = vmul.f32 -1.442695, %v75_v23 }
  0x90   :  { %247 = vpow2.f32 %v238_v24 }
  0x96   :  { %v248_v25 = vpop.eup %247 }
  0x97   :  { %v80_v26 = vadd.f32 1.0, %v248_v25 }
  0x99   :  { %249 = vrcp.f32 %v80_v26  ;;  %v92_v30 = vand.u32 2147483648, %v80_v26  ;;  %v90_v32 = vand.u32 2147483647, %v80_v26  ;;  %vm86_vm2 = vweird.f32 %v80_v26 }
  0x9b   :  { %v93_v34 = vor.u32 1.1754944e-38, %v92_v30  ;;  %vm91_vm4 = vcmp.eq.f32.partialorder %v90_v32, 8.507059e+37 }
  0x9f   :  { %v250_v27 = vpop.eup %249 }
  0xa0   :  { %v82_v28 = vmul.f32 %v250_v27, %v80_v26  ;;  %vm87_vm1 = vweird.f32 %v250_v27 }
  0xa1   :  { %vm88_vm3 = vmor %vm86_vm2, %vm87_vm1 }
  0xa2   :  { %v83_v29 = vsub.f32 1.0, %v82_v28 }
  0xa4   :  { %v84_v31 = vmul.f32 %v250_v27, %v83_v29 }
  0xa6   :  { %v85_v33 = vadd.f32 %v250_v27, %v84_v31 }
  0xa8   :  { %v89_v35 = vsel %vm88_vm3, %v250_v27, %v85_v33 }
  0xa9   :  { %v94_v36 = vsel %vm91_vm4, %v93_v34, %v89_v35 }
  0xaa   :  { %v96_v37 = vmul.f32 %v94_v36, %v75_v23 }
  0xac   :  { %133 = vmatmul.f32.vlgmr.msra.gmra.mxu1 %v96_v37 }
 0x129   :  { %v134_v55 = vpop.f32.mrf.mxu1 }
 0x12a   :  { %v135_v56 = vadd.f32 %v245_v53, %v134_v55 }
 0x12c   :  { %v239_v57 = vmul.f32 -1.442695, %v135_v56 }
 0x12e   :  { %251 = vpow2.f32 %v239_v57 }
 0x134   :  { %v252_v58 = vpop.eup %251 }
 0x135   :  { %v140_v59 = vadd.f32 1.0, %v252_v58 }
 0x137   :  { %253 = vrcp.f32 %v140_v59  ;;  %v152_v63 = vand.u32 2147483648, %v140_v59  ;;  %v150_v1 = vand.u32 2147483647, %v140_v59  ;;  %vm146_vm6 = vweird.f32 %v140_v59 }
 0x139   :  { %v153_v3 = vor.u32 1.1754944e-38, %v152_v63  ;;  %vm151_vm8 = vcmp.eq.f32.partialorder %v150_v1, 8.507059e+37 }
 0x13d   :  { %v254_v60 = vpop.eup %253 }
 0x13e   :  { %v142_v61 = vmul.f32 %v254_v60, %v140_v59  ;;  %vm147_vm5 = vweird.f32 %v254_v60 }
 0x13f   :  { %vm148_vm7 = vmor %vm146_vm6, %vm147_vm5 }
 0x140   :  { %v143_v62 = vsub.f32 1.0, %v142_v61 }
 0x142   :  { %v144_v0 = vmul.f32 %v254_v60, %v143_v62 }
 0x144   :  { %v145_v2 = vadd.f32 %v254_v60, %v144_v0 }
 0x146   :  { %v149_v4 = vsel %vm148_vm7, %v254_v60, %v145_v2 }
 0x147   :  { %v154_v5 = vsel %vm151_vm8, %v153_v3, %v149_v4 }
 0x148   :  { %v156_v6 = vmul.f32 %v154_v5, %v135_v56 }
 0x14a   :  { %193 = vmatmul.f32.vlgmr.msra.gmra.mxu2 %v156_v6 }
 0x1cd   :  { %v194_v8 = vpop.f32.mrf.mxu2 }
 0x1ce   :  { %v195_v9 = vadd.f32 %v246_v7, %v194_v8 }
 0x1d0   :  { %200 = vrot.lane.b32.xlu0 %v195_v9, %s335_s15  ;;  %198 = vst.msk [vmem:[#allocation5] sm:$0xff] %vm197_vm9, %v195_v9 }
 0x1d1   :  { %214 = dma.vmem_to_hbm [thread:$0]  %s210_s11, 128, %s212_s14, [#allocation4]  }
 0x242   :  { %v201_v10 = vpop.permute.xlu0 %200 }
 0x243   :  { %203 = vst.msk [vmem:[#allocation6] sm:$0xff] %vm197_vm9, %v201_v10 }
 0x244   :  { %225 = dma.vmem_to_hbm [thread:$0]  %s221_s16, 128, %s223_s6, [#allocation7]  }
 0x245   :  { %329 = dma.done.wait [#allocation4], 128  }
 0x246   :  { %330 = vsyncadd [#allocation4], 4294967168 }
 0x247   :  { %331 = dma.done.wait [#allocation7], 128  }
 0x248   :  { %332 = vsyncadd [#allocation7], 4294967168 }
 0x249   :  { %234 = vsyncpa [#allocation3], 1 }
 0x24a   :  { %235 = vsyncpa [#allocation4], 1 }
 0x24b   :  { %236 = vsyncpa [#allocation7], 1 }

</bundles_post_ra>
